<compile_context>
chip_gen: v7x
topology: tpu7x:2x2x1
jax: 0.10.0
libtpu: 0.0.40
codegen_flags: <defaults>
</compile_context>

<pallas_src>
import numpy as np
import jax
import jax.numpy as jnp
from jax import lax
from jax.experimental import pallas as pl
from jax.experimental.pallas import tpu as pltpu

# ---------------- model dims (small, consistent with the module) ----------------
BATCH = 2
TIME = 8
INPUT_DIM = 16
EMBED_DIM = 32
OUTPUT_CELL_DIM = 32
N_CLASSES = 4

BT = BATCH * TIME
LANES = 128            # lane-dense padding width for all constant operands / the output slab
NEG = -1e30            # additive mask / padded-class bias

_T_SHIFT = TIME.bit_length() - 1
assert TIME == (1 << _T_SHIFT), "in-kernel block-diag mask uses a shift; TIME must be a power of 2"


def _pad8(n):
    return -(-n // 8) * 8


# Row offsets inside the single packed constant buffer (all multiples of 8 sublanes).
R_WAMP = 0
R_BAMP = R_WAMP + _pad8(INPUT_DIM)
R_M    = R_BAMP + 8
R_W1D  = R_M + _pad8(2 * EMBED_DIM)
R_B1   = R_W1D + _pad8(2 * EMBED_DIM)
R_W2   = R_B1 + 8
R_B2   = R_W2 + LANES
PACK_ROWS = R_B2 + 8


def qattn_kernel(x_ref, pack_ref, out_ref):
    f32 = jnp.float32

    # static sublane-slice unpack of the single packed constant buffer
    W_amp = pack_ref[R_WAMP:R_WAMP + INPUT_DIM, :]        # (Din, 128), lanes >= D are zero
    b_amp = pack_ref[R_BAMP:R_BAMP + 1, :]                # (1, 128)
    M     = pack_ref[R_M:R_M + 2 * EMBED_DIM, :]          # (2D, 128), rows = [Mr ; Mi]
    W1d   = pack_ref[R_W1D:R_W1D + 2 * EMBED_DIM, :]      # (2D, 128), rows = [W1 ; W1]
    b1    = pack_ref[R_B1:R_B1 + 1, :]                    # (1, 128)
    W2    = pack_ref[R_W2:R_W2 + LANES, :]                # (128, 128)
    b2    = pack_ref[R_B2:R_B2 + 1, :]                    # (1, 128), lanes >= C carry NEG

    x = x_ref[...]                                        # (BT, Din) f32

    # --- amp_projection + F.normalize(dim=-1, eps=1e-12); padded lanes are exactly zero so the
    # L2 norm over 128 lanes equals the norm over the real D lanes.
    a = jnp.dot(x, W_amp, preferred_element_type=f32) + b_amp            # (BT, 128)
    ssq = jnp.sum(a * a, axis=-1, keepdims=True)
    a = a * lax.rsqrt(jnp.maximum(ssq, 1e-24))                           # EUP rsqrt

    # --- QMeasurement path (independent of the softmax chain, overlaps it):
    #   <v_k|psi_s> = a_s.Mr_k + i a_s.Mi_k (constant phase already folded into Mr/Mi)
    #   q[s,k] = |<v_k|psi_s>|^2 ;  y = q @ W1 == (c*c) @ [W1 ; W1]
    c = lax.dot_general(a, M, (((1,), (1,)), ((), ())),
                        preferred_element_type=f32)                      # (BT, 2D)
    y = jnp.dot(c * c, W1d, preferred_element_type=f32)                  # (BT, 128) == q @ W1

    # --- QOuter + QAttention scores: score(t,s) = (a_s . a_t)^2 ; key weights are ones (dropped).
    g = lax.dot_general(a, a, (((1,), (1,)), ((), ())),
                        preferred_element_type=f32)                      # (BT, BT)
    r = lax.broadcasted_iota(jnp.int32, (BT, BT), 0)
    s = lax.broadcasted_iota(jnp.int32, (BT, BT), 1)
    same_batch = (r >> _T_SHIFT) == (s >> _T_SHIFT)      # folded batches stay independent
    scores = jnp.where(same_batch, g * g, NEG)
    scores = scores - jnp.max(scores, axis=-1, keepdims=True)
    e = jnp.exp(scores)
    alpha = e * pl.reciprocal(jnp.sum(e, axis=-1, keepdims=True), approx=True)   # (BT, BT)

    # --- mixture commutes with measurement & fc1 (all linear): h = relu(alpha @ (q@W1) + b1)
    h = jnp.maximum(jnp.dot(alpha, y, preferred_element_type=f32) + b1, 0.0)     # (BT, 128)
    # TODO(synk): training-mode dropout (out_dropout_rate) not implemented; eval semantics only.
    logits = jnp.dot(h, W2, preferred_element_type=f32) + b2                     # (BT, 128)

    # --- log_softmax over classes; padded class lanes carry NEG so exp() underflows to 0.
    z = logits - jnp.max(logits, axis=-1, keepdims=True)
    out_ref[...] = z - jnp.log(jnp.sum(jnp.exp(z), axis=-1, keepdims=True))


def prepare_pack(params):
    """One-time parameter preprocessing (hoisted out of the per-call forward): fold the
    timestep-constant phase into the measurement vectors, stack Mr/Mi and W1/W1, lane-pad
    everything to 128 and concatenate into a single (PACK_ROWS, 128) f32 buffer so the
    kernel needs exactly two input DMAs (x + pack)."""
    f32 = jnp.float32
    D, H, C = EMBED_DIM, OUTPUT_CELL_DIM, N_CLASSES

    ph = params["phase"].astype(f32)
    cosp, sinp = jnp.cos(ph), jnp.sin(ph)
    # <v_k|psi_s> = sum_d a_{s,d} * (conj(v_k)_d * e^{i phi_d})
    Mr = params["Vr"] * cosp[None, :] + params["Vi"] * sinp[None, :]     # (D, D)
    Mi = params["Vr"] * sinp[None, :] - params["Vi"] * cosp[None, :]     # (D, D)
    M = jnp.concatenate([Mr, Mi], axis=0)                                # (2D, D)
    W1d = jnp.concatenate([params["W1"], params["W1"]], axis=0)          # (2D, H)

    def pad(arr, rows, fill=0.0):
        buf = jnp.full((rows, LANES), fill, f32)
        return buf.at[:arr.shape[0], :arr.shape[1]].set(arr.astype(f32))

    pack = jnp.concatenate([
        pad(params["W_amp"], _pad8(INPUT_DIM)),
        pad(params["b_amp"].reshape(1, D), 8),
        pad(M, _pad8(2 * D)),
        pad(W1d, _pad8(2 * D)),
        pad(params["b1"].reshape(1, H), 8),
        pad(params["W2"], LANES),
        pad(params["b2"].reshape(1, C), 8, fill=NEG),
    ], axis=0)
    assert pack.shape == (PACK_ROWS, LANES)
    return pack


def qattn_forward(x, pack):
    B, T, Din = x.shape
    assert (B, T, Din) == (BATCH, TIME, INPUT_DIM)
    out = pl.pallas_call(
        qattn_kernel,
        out_shape=jax.ShapeDtypeStruct((BT, LANES), jnp.float32),
        grid=(1,),   # whole batch folded into one invocation; reintroduce a "parallel" batch
                     # axis (or core_map over the 2-TC mesh) on v7x only when BT grows large.
        in_specs=[pl.BlockSpec((BT, Din), lambda i: (0, 0)),
                  pl.BlockSpec((PACK_ROWS, LANES), lambda i: (0, 0))],
        out_specs=pl.BlockSpec((BT, LANES), lambda i: (0, 0)),
        compiler_params=pltpu.CompilerParams(dimension_semantics=("arbitrary",)),
    )(x.reshape(BT, Din).astype(jnp.float32), pack)
    return out[:, :N_CLASSES].reshape(B, T, N_CLASSES)


# ---------------- pure-JAX reference (explicit density matrices, f32 highest) ----------------
def qattn_reference(x, params):
    with jax.default_matmul_precision("highest"):
        W_amp, b_amp = params["W_amp"], params["b_amp"]
        phase = params["phase"]
        Vr, Vi = params["Vr"], params["Vi"]
        W1, b1, W2, b2 = params["W1"], params["b1"], params["W2"], params["b2"]
        B, T, _ = x.shape

        a = x @ W_amp + b_amp
        a = a / jnp.maximum(jnp.linalg.norm(a, axis=-1, keepdims=True), 1e-12)
        pr = a * jnp.cos(phase)
        pi_ = a * jnp.sin(phase)

        # QOuter: rho_s = |psi_s><psi_s|
        rho_r = pr[..., :, None] * pr[..., None, :] + pi_[..., :, None] * pi_[..., None, :]
        rho_i = pi_[..., :, None] * pr[..., None, :] - pr[..., :, None] * pi_[..., None, :]

        # QAttention: score(t,s) = Re(psi_t^dag rho_s psi_t), key weights are ones
        scores = (jnp.einsum('btd,bsde,bte->bts', pr, rho_r, pr)
                  + jnp.einsum('btd,bsde,bte->bts', pi_, rho_r, pi_)
                  + jnp.einsum('btd,bsde,bte->bts', pi_, rho_i, pr)
                  - jnp.einsum('btd,bsde,bte->bts', pr, rho_i, pi_))
        w = jnp.ones((B, T, 1), jnp.float32)
        scores = scores * jnp.swapaxes(w, 1, 2)
        alpha = jax.nn.softmax(scores, axis=-1)
        mix_r = jnp.einsum('bts,bsde->btde', alpha, rho_r)
        mix_i = jnp.einsum('bts,bsde->btde', alpha, rho_i)

        # QMeasurement: P_k = |v_k><v_k|, p_k = Tr(P_k rho)
        Pr = Vr[:, :, None] * Vr[:, None, :] + Vi[:, :, None] * Vi[:, None, :]
        Pi = Vi[:, :, None] * Vr[:, None, :] - Vr[:, :, None] * Vi[:, None, :]
        probs = (jnp.einsum('btde,kde->btk', mix_r, Pr)
                 + jnp.einsum('btde,kde->btk', mix_i, Pi))

        h = jax.nn.relu(probs @ W1 + b1)
        logits = h @ W2 + b2
        return jax.nn.log_softmax(logits, axis=2)


def make_params(key):
    ks = jax.random.split(key, 8)
    W_amp = 0.2 * jax.random.normal(ks[0], (INPUT_DIM, EMBED_DIM), jnp.float32)
    b_amp = 0.1 * jax.random.normal(ks[1], (EMBED_DIM,), jnp.float32)
    # PositionEmbedding table; only row 0 is ever used (indices are all zeros).
    phase = jax.random.uniform(ks[2], (EMBED_DIM,), jnp.float32,
                               minval=-np.pi, maxval=np.pi)
    # QMeasurement unitary kernel: complex QR of a random matrix (rows = measurement vectors).
    A = (np.asarray(jax.random.normal(ks[3], (EMBED_DIM, EMBED_DIM), jnp.float32))
         + 1j * np.asarray(jax.random.normal(ks[4], (EMBED_DIM, EMBED_DIM), jnp.float32)))
    Q, _ = np.linalg.qr(A)
    Vr = jnp.asarray(np.real(Q), jnp.float32)
    Vi = jnp.asarray(np.imag(Q), jnp.float32)
    W1 = 0.2 * jax.random.normal(ks[5], (EMBED_DIM, OUTPUT_CELL_DIM), jnp.float32)
    b1 = jnp.zeros((OUTPUT_CELL_DIM,), jnp.float32)
    W2 = 0.2 * jax.random.normal(ks[6], (OUTPUT_CELL_DIM, N_CLASSES), jnp.float32)
    b2 = 0.05 * jax.random.normal(ks[7], (N_CLASSES,), jnp.float32)
    return dict(W_amp=W_amp, b_amp=b_amp, phase=phase, Vr=Vr, Vi=Vi,
                W1=W1, b1=b1, W2=W2, b2=b2)


if __name__ == "__main__":
    key = jax.random.PRNGKey(0)
    kx, kp = jax.random.split(key)
    x = jax.random.normal(kx, (BATCH, TIME, INPUT_DIM), jnp.float32)
    params = make_params(kp)

    # one-time parameter prep, hoisted out of the per-call forward path
    pack = jax.block_until_ready(prepare_pack(params))

    fwd = jax.jit(qattn_forward)
    out = jax.block_until_ready(fwd(x, pack))

    ref = jax.block_until_ready(qattn_reference(x, params))
    np.testing.assert_allclose(np.asarray(out), np.asarray(ref), rtol=1e-2, atol=1e-2)
    assert out.shape == (BATCH, TIME, N_CLASSES)
    print("KERNEL_OK")
</pallas_src>

<mosaic_0001>
module attributes {stable_mosaic.version = 11 : i64} {
  func.func @qattn_kernel(%arg0: i32, %arg1: memref<16x16xf32, #tpu.memory_space<vmem>>, %arg2: memref<296x128xf32, #tpu.memory_space<vmem>>, %arg3: memref<16x128xf32, #tpu.memory_space<vmem>>) attributes {dimension_semantics = [#tpu.dimension_semantics<arbitrary>], iteration_bounds = array<i64: 1>, scalar_prefetch = 0 : i64, scratch_operands = 0 : i64, tpu.core_type = #tpu.core_type<tc>, window_params = [{pipeline_mode = #tpu.pipeline_mode<synchronous>, transform_indices = @transform_0, window_bounds = array<i64: 16, 16>}, {pipeline_mode = #tpu.pipeline_mode<synchronous>, transform_indices = @transform_1, window_bounds = array<i64: 296, 128>}, {pipeline_mode = #tpu.pipeline_mode<synchronous>, transform_indices = @transform_2, window_bounds = array<i64: 16, 128>}]} {
    %c0 = arith.constant 0 : index
    %c0_0 = arith.constant 0 : index
    %0 = vector.load %arg2[%c0, %c0_0] : memref<296x128xf32, #tpu.memory_space<vmem>>, vector<16x128xf32>
    %c16 = arith.constant 16 : index
    %c0_1 = arith.constant 0 : index
    %1 = vector.load %arg2[%c16, %c0_1] : memref<296x128xf32, #tpu.memory_space<vmem>>, vector<1x128xf32>
    %c24 = arith.constant 24 : index
    %c0_2 = arith.constant 0 : index
    %2 = vector.load %arg2[%c24, %c0_2] : memref<296x128xf32, #tpu.memory_space<vmem>>, vector<64x128xf32>
    %c88 = arith.constant 88 : index
    %c0_3 = arith.constant 0 : index
    %3 = vector.load %arg2[%c88, %c0_3] : memref<296x128xf32, #tpu.memory_space<vmem>>, vector<64x128xf32>
    %c152 = arith.constant 152 : index
    %c0_4 = arith.constant 0 : index
    %4 = vector.load %arg2[%c152, %c0_4] : memref<296x128xf32, #tpu.memory_space<vmem>>, vector<1x128xf32>
    %c160 = arith.constant 160 : index
    %c0_5 = arith.constant 0 : index
    %5 = vector.load %arg2[%c160, %c0_5] : memref<296x128xf32, #tpu.memory_space<vmem>>, vector<128x128xf32>
    %c288 = arith.constant 288 : index
    %c0_6 = arith.constant 0 : index
    %6 = vector.load %arg2[%c288, %c0_6] : memref<296x128xf32, #tpu.memory_space<vmem>>, vector<1x128xf32>
    %c0_7 = arith.constant 0 : index
    %c0_8 = arith.constant 0 : index
    %7 = vector.load %arg1[%c0_7, %c0_8] : memref<16x16xf32, #tpu.memory_space<vmem>>, vector<16x16xf32>
    %cst = arith.constant dense<0.000000e+00> : vector<16x128xf32>
    %8 = tpu.matmul %7, %0, %cst {dimension_numbers = #tpu.dot_dimension_numbers<[1], [0], [0], [1], [0, 0, 1, 1], [], []>} : vector<16x16xf32>, vector<16x128xf32>, vector<16x128xf32> -> vector<16x128xf32>
    %9 = vector.broadcast %1 : vector<1x128xf32> to vector<16x128xf32>
    %10 = arith.addf %8, %9 : vector<16x128xf32>
    %11 = arith.mulf %10, %10 : vector<16x128xf32>
    %cst_9 = arith.constant dense<0.000000e+00> : vector<16xf32>
    %12 = vector.multi_reduction <add>, %11, %cst_9 [1] : vector<16x128xf32> to vector<16xf32>
    %13 = vector.shape_cast %12 : vector<16xf32> to vector<16x1xf32>
    %cst_10 = arith.constant 1.000000e-24 : f32
    %14 = vector.broadcast %cst_10 : f32 to vector<16x1xf32>
    %15 = arith.maximumf %13, %14 : vector<16x1xf32>
    %16 = math.rsqrt %15 : vector<16x1xf32>
    %17 = vector.broadcast %16 : vector<16x1xf32> to vector<16x128xf32>
    %18 = arith.mulf %10, %17 : vector<16x128xf32>
    %cst_11 = arith.constant dense<0.000000e+00> : vector<16x64xf32>
    %19 = tpu.matmul %18, %2, %cst_11 {dimension_numbers = #tpu.dot_dimension_numbers<[1], [1], [0], [0], [0, 0, 1, 0], [], []>} : vector<16x128xf32>, vector<64x128xf32>, vector<16x64xf32> -> vector<16x64xf32>
    %20 = arith.mulf %19, %19 : vector<16x64xf32>
    %cst_12 = arith.constant dense<0.000000e+00> : vector<16x128xf32>
    %21 = tpu.matmul %20, %3, %cst_12 {dimension_numbers = #tpu.dot_dimension_numbers<[1], [0], [0], [1], [0, 0, 1, 1], [], []>} : vector<16x64xf32>, vector<64x128xf32>, vector<16x128xf32> -> vector<16x128xf32>
    %cst_13 = arith.constant dense<0.000000e+00> : vector<16x16xf32>
    %22 = tpu.matmul %18, %18, %cst_13 {dimension_numbers = #tpu.dot_dimension_numbers<[1], [1], [0], [0], [0, 0, 1, 0], [], []>} : vector<16x128xf32>, vector<16x128xf32>, vector<16x16xf32> -> vector<16x16xf32>
    %23 = tpu.iota {dimensions = array<i32: 0>} : vector<16x16xi32>
    %24 = tpu.iota {dimensions = array<i32: 1>} : vector<16x16xi32>
    %c3_i32 = arith.constant 3 : i32
    %25 = vector.broadcast %c3_i32 : i32 to vector<16x16xi32>
    %26 = arith.shrsi %23, %25 : vector<16x16xi32>
    %c3_i32_14 = arith.constant 3 : i32
    %27 = vector.broadcast %c3_i32_14 : i32 to vector<16x16xi32>
    %28 = arith.shrsi %24, %27 : vector<16x16xi32>
    %29 = arith.cmpi eq, %26, %28 : vector<16x16xi32>
    %30 = arith.mulf %22, %22 : vector<16x16xf32>
    %cst_15 = arith.constant -1.000000e+30 : f32
    %31 = vector.broadcast %cst_15 : f32 to vector<16x16xf32>
    %32 = arith.select %29, %30, %31 : vector<16x16xi1>, vector<16x16xf32>
    %cst_16 = arith.constant dense<0xFF800000> : vector<16xf32>
    %33 = vector.multi_reduction <maximumf>, %32, %cst_16 [1] : vector<16x16xf32> to vector<16xf32>
    %34 = vector.shape_cast %33 : vector<16xf32> to vector<16x1xf32>
    %35 = vector.broadcast %34 : vector<16x1xf32> to vector<16x16xf32>
    %36 = arith.subf %32, %35 : vector<16x16xf32>
    %37 = math.exp %36 : vector<16x16xf32>
    %cst_17 = arith.constant dense<0.000000e+00> : vector<16xf32>
    %38 = vector.multi_reduction <add>, %37, %cst_17 [1] : vector<16x16xf32> to vector<16xf32>
    %39 = vector.shape_cast %38 : vector<16xf32> to vector<16x1xf32>
    %40 = tpu.reciprocal %39 {approx = true} : vector<16x1xf32> -> vector<16x1xf32>
    %41 = vector.broadcast %40 : vector<16x1xf32> to vector<16x16xf32>
    %42 = arith.mulf %37, %41 : vector<16x16xf32>
    %cst_18 = arith.constant dense<0.000000e+00> : vector<16x128xf32>
    %43 = tpu.matmul %42, %21, %cst_18 {dimension_numbers = #tpu.dot_dimension_numbers<[1], [0], [0], [1], [0, 0, 1, 1], [], []>} : vector<16x16xf32>, vector<16x128xf32>, vector<16x128xf32> -> vector<16x128xf32>
    %44 = vector.broadcast %4 : vector<1x128xf32> to vector<16x128xf32>
    %45 = arith.addf %43, %44 : vector<16x128xf32>
    %cst_19 = arith.constant 0.000000e+00 : f32
    %46 = vector.broadcast %cst_19 : f32 to vector<16x128xf32>
    %47 = arith.maximumf %45, %46 : vector<16x128xf32>
    %cst_20 = arith.constant dense<0.000000e+00> : vector<16x128xf32>
    %48 = tpu.matmul %47, %5, %cst_20 {dimension_numbers = #tpu.dot_dimension_numbers<[1], [0], [0], [1], [0, 0, 1, 1], [], []>} : vector<16x128xf32>, vector<128x128xf32>, vector<16x128xf32> -> vector<16x128xf32>
    %49 = vector.broadcast %6 : vector<1x128xf32> to vector<16x128xf32>
    %50 = arith.addf %48, %49 : vector<16x128xf32>
    %cst_21 = arith.constant dense<0xFF800000> : vector<16xf32>
    %51 = vector.multi_reduction <maximumf>, %50, %cst_21 [1] : vector<16x128xf32> to vector<16xf32>
    %52 = vector.shape_cast %51 : vector<16xf32> to vector<16x1xf32>
    %53 = vector.broadcast %52 : vector<16x1xf32> to vector<16x128xf32>
    %54 = arith.subf %50, %53 : vector<16x128xf32>
    %55 = math.exp %54 : vector<16x128xf32>
    %cst_22 = arith.constant dense<0.000000e+00> : vector<16xf32>
    %56 = vector.multi_reduction <add>, %55, %cst_22 [1] : vector<16x128xf32> to vector<16xf32>
    %57 = vector.shape_cast %56 : vector<16xf32> to vector<16x1xf32>
    %58 = math.log %57 : vector<16x1xf32>
    %59 = vector.broadcast %58 : vector<16x1xf32> to vector<16x128xf32>
    %60 = arith.subf %54, %59 : vector<16x128xf32>
    %c0_23 = arith.constant 0 : index
    %c0_24 = arith.constant 0 : index
    %61 = vector.load %arg3[%c0_23, %c0_24] : memref<16x128xf32, #tpu.memory_space<vmem>>, vector<16x128xf32>
    tpu.vector_store %arg3[%c0_23, %c0_24], %60 {strides = array<i32>} : memref<16x128xf32, #tpu.memory_space<vmem>>, vector<16x128xf32>,
    return
  }
  func.func @transform_0(%arg0: i32) -> (i32, i32) {
    %c0_i32 = arith.constant 0 : i32
    %c0_i32_0 = arith.constant 0 : i32
    %c0_i32_1 = arith.constant 0 : i32
    return %c0_i32, %c0_i32_0 : i32, i32
  }
  func.func @transform_1(%arg0: i32) -> (i32, i32) {
    %c0_i32 = arith.constant 0 : i32
    %c0_i32_0 = arith.constant 0 : i32
    %c0_i32_1 = arith.constant 0 : i32
    return %c0_i32, %c0_i32_0 : i32, i32
  }
  func.func @transform_2(%arg0: i32) -> (i32, i32) {
    %c0_i32 = arith.constant 0 : i32
    %c0_i32_0 = arith.constant 0 : i32
    %c0_i32_1 = arith.constant 0 : i32
    return %c0_i32, %c0_i32_0 : i32, i32
  }
}

</mosaic_0001>

<bundles_post_ra>
// kernel: qattn_forward.1
= control target key start
LH: loop header
LB: loop body
LE: loop exit
PB: predicated region body
PF: predicated region fallthrough
CT: control target
= control target key end

     0   :  { %7 = vsyncpa [#allocation3], 0  ;;  %s998_s0 = inlined_call_operand.hbm [shape: f32[16,16], index: 0, kind: input, shape index: {}]   ;;  %s999_s1 = inlined_call_operand.hbm [shape: f32[296,128], index: 1, kind: input, shape index: {}]   ;;  %s1000_s2 = inlined_call_operand.vmem [shape: f32[16,128], index: 2, kind: output, shape index: {}]  }
   0x1   :  { %8 = vsyncpa [#allocation5], 0  ;;  %s941_s9 = smov [#allocation2]   ;;  %s893_s13 = scalar_lea.hbm %s998_s0, 256 }
   0x2   :  { %s14_s10 = sshll.u32 %s941_s9, 4  ;;  %p894_p0 = scmp.ne.s32.totalorder %s998_s0, %s893_s13  ;;  %s15_s10 = int_to_ptr.vmem [resolvable:$true] %s14_s10 }
   0x3   :  { %p897_p1 = scmp.lt.u32.totalorder %s893_s13, %s998_s0 }
   0x5   :  { %p899_p2 = pnand %p897_p1, %p894_p0 }
   0x7   :  { %902 = shalt.err (!%p899_p2)
}
   0x8   :  { %s903_s18 = scalar_lea.vmem %s15_s10, 256  ;;  %p908_p4 = scmp.lt.s32.totalorder %s15_s10, %s15_s10 }
   0x9   :  { %p904_p3 = scmp.ne.s32.totalorder %s15_s10, %s903_s18  ;;  %p909_p5 = scmp.lt.s32.totalorder %s903_s18, %s903_s18 }
   0xb   :  { %p910_p6 = por %p909_p5, %p908_p4 }
   0xd   :  { %p911_p7 = pnand %p910_p6, %p904_p3 }
   0xf   :  { %914 = shalt.err (!%p911_p7)
}
  0x10   :  { %s942_s19 = smov 128   ;;  %s943_s20 = smov 8  }
  0x11   :  { %20 = dma.hbm_to_vmem [thread:$0]  %s998_s0, 256, %s15_s10, [#allocation3], %s942_s19, %s942_s19, %s943_s20  }
  0x12   :  { %s944_s23 = smov [#allocation4]   ;;  %s915_s27 = scalar_lea.hbm %s999_s1, 4736 }
  0x13   :  { %s26_s24 = sshll.u32 %s944_s23, 4  ;;  %p916_p8 = scmp.ne.s32.totalorder %s999_s1, %s915_s27  ;;  %s27_s24 = int_to_ptr.vmem [resolvable:$true] %s26_s24 }
  0x14   :  { %p919_p9 = scmp.lt.u32.totalorder %s915_s27, %s999_s1 }
  0x16   :  { %p921_p10 = pnand %p919_p9, %p916_p8 }
  0x18   :  { %924 = shalt.err (!%p921_p10)
}
  0x19   :  { %s925_s4 = scalar_lea.vmem %s27_s24, 4736  ;;  %p930_p12 = scmp.lt.s32.totalorder %s27_s24, %s27_s24 }
  0x1a   :  { %p926_p11 = scmp.ne.s32.totalorder %s27_s24, %s925_s4  ;;  %p931_p13 = scmp.lt.s32.totalorder %s925_s4, %s925_s4 }
  0x1c   :  { %p932_p0 = por %p931_p13, %p930_p12 }
  0x1e   :  { %p933_p1 = pnand %p932_p0, %p926_p11 }
  0x20   :  { %936 = shalt.err (!%p933_p1)
}
  0x21   :  { %32 = dma.hbm_to_vmem [thread:$0]  %s999_s1, 4736, %s27_s24, [#allocation5], %s942_s19, %s942_s19, %s943_s20  }
  0x22   :  { %937 = dma.done.wait [#allocation3], 256  }
  0x23   :  { %938 = vsyncadd [#allocation3], 4294967040 }
  0x24   :  { %939 = dma.done.wait [#allocation5], 4736  }
  0x25   :  { %940 = vsyncadd [#allocation5], 4294962560  ;;  %vm82_vm0 = vcmask 130048   ;;  %v39_v0 = vld [vmem:[#allocation4] sm:$0xff]  ;;  %v40_v1 = vld [vmem:[#allocation4 + $0x8] sm:$0xff]  ;;  %v410_v45 = vlaneseq  ;;  %vm253_vm1 = vcmask 523264  }
  0x26   :  { %v76_v2 = vld [vmem:[#allocation2] sm:$0xff]  ;;  %v793_v3 = vpack.c.bf16 %v40_v1, %v39_v0  ;;  %v77_v4 = vld [vmem:[#allocation2 + $0x8] sm:$0xff]  ;;  %v43_v6 = vld [vmem:[#allocation4 + $0x20] sm:$0xff] }
  0x27   :  { %703 = vmatprep.mubr.msk.f32.mxu0 %vm82_vm0, %v76_v2  ;;  %v42_v5 = vld [vmem:[#allocation4 + $0x18] sm:$0xff]  ;;  %v44_v7 = vld [vmem:[#allocation4 + $0x28] sm:$0xff]  ;;  %v45_v9 = vld [vmem:[#allocation4 + $0x30] sm:$0xff]  ;;  %v411_v48 = vshrl.u32 %v410_v45, 7  ;;  %v414_v51 = vand.u32 127, %v410_v45 }
  0x28   :  { %794 = vmatprep.subr.bf16.mxu0 %v793_v3  ;;  %v797_v8 = vpack.c.bf16 %v43_v6, %v42_v5  ;;  %v801_v10 = vpack.c.bf16 %v45_v9, %v44_v7  ;;  %v640_v11 = vld [vmem:[#allocation4 + $0x10] ss:$0 sm:$0xff]  ;;  %v46_v18 = vld [vmem:[#allocation4 + $0x38] sm:$0xff]  ;;  %v47_v19 = vld [vmem:[#allocation4 + $0x40] sm:$0xff] }
  0x29   :  { %796 = vmatpush3.bf16.msra.mxu0 %v793_v3  ;;  %v805_v20 = vpack.c.bf16 %v47_v19, %v46_v18  ;;  %v48_v21 = vld [vmem:[#allocation4 + $0x48] sm:$0xff]  ;;  %v49_v22 = vld [vmem:[#allocation4 + $0x50] sm:$0xff]  ;;  %v50_v24 = vld [vmem:[#allocation4 + $0x58] sm:$0xff]  ;;  %v412_v52 = vadd.s32 8, %v411_v48  ;;  %v415_v53 = vshra.s32 %v411_v48, 3  ;;  %v417_v54 = vshra.s32 %v414_v51, 3 }
  0x2a   :  { %798 = vmatprep.subr.bf16.mxu1 %v797_v8  ;;  %v809_v23 = vpack.c.bf16 %v49_v22, %v48_v21  ;;  %v51_v25 = vld [vmem:[#allocation4 + $0x60] sm:$0xff]  ;;  %v52_v33 = vld [vmem:[#allocation4 + $0x68] sm:$0xff]  ;;  %v53_v34 = vld [vmem:[#allocation4 + $0x70] sm:$0xff] }
  0x2b   :  { %800 = vmatpush3.bf16.xpose.msra.mxu1 %v797_v8  ;;  %v813_v26 = vpack.c.bf16 %v51_v25, %v50_v24  ;;  %v817_v37 = vpack.c.bf16 %v53_v34, %v52_v33  ;;  %v54_v38 = vld [vmem:[#allocation4 + $0x78] sm:$0xff]  ;;  %v55_v39 = vld [vmem:[#allocation4 + $0x80] sm:$0xff]  ;;  %v56_v42 = vld [vmem:[#allocation4 + $0x88] sm:$0xff]  ;;  %v416_v55 = vshra.s32 %v412_v52, 3  ;;  %vm418_vm2 = vcmp.eq.s32.totalorder %v415_v53, %v417_v54 }
  0x2c   :  { %704 = vmatmul.mubr.msk.f32.vlgmr.msra.gmra.mrb[0].mxu0 %vm82_vm0, %v77_v4  ;;  %802 = vmatprep.subr.bf16.mxu1 %v801_v10  ;;  %v821_v41 = vpack.c.bf16 %v55_v39, %v54_v38  ;;  %v57_v43 = vld [vmem:[#allocation4 + $0x90] sm:$0xff]  ;;  %v62_v21 = vld [vmem:[#allocation4 + $0xb8] sm:$0xff]  ;;  %v63_v25 = vld [vmem:[#allocation4 + $0xc0] sm:$0xff] }
  0x2d   :  { %v825_v44 = vpack.c.bf16 %v57_v43, %v56_v42  ;;  %vm419_vm3 = vcmp.eq.s32.totalorder %v416_v55, %v417_v54  ;;  %v69_v34 = vld [vmem:[#allocation4 + $0xf0] sm:$0xff]  ;;  %v72_v38 = vld [vmem:[#allocation4 + $0x108] sm:$0xff]  ;;  %v645_v43 = vld [vmem:[#allocation4 + $0x98] ss:$0 sm:$0xff] }
  0x33   :  { %804 = vmatpush3.bf16.xpose.msra.mxu1 %v801_v10  ;;  %v59_v10 = vld [vmem:[#allocation4 + $0xa0] sm:$0xff] }
  0x34   :  { %806 = vmatprep.subr.bf16.mxu1 %v805_v20 }
  0x3b   :  { %808 = vmatpush3.bf16.xpose.msra.mxu1 %v805_v20  ;;  %v61_v20 = vld [vmem:[#allocation4 + $0xb0] sm:$0xff] }
  0x3c   :  { %810 = vmatprep.subr.bf16.mxu1 %v809_v23  ;;  %v841_v24 = vpack.c.bf16 %v62_v21, %v61_v20 }
  0x43   :  { %812 = vmatpush3.bf16.xpose.msra.mxu1 %v809_v23 }
  0x44   :  { %814 = vmatprep.subr.bf16.mxu1 %v813_v26 }
  0xff   :  { %v705_v12 = vpop.f32.mrb[0].mxu0 }
 0x100   :  { %v155_v13 = vpop.f32.mrb[1].mxu0  ;;  %v161_v15 = vadd.f32 %v705_v12, %v640_v11 }
 0x101   :  { %v156_v14 = vadd.f32 %v640_v11, %v155_v13  ;;  %v60_v11 = vld [vmem:[#allocation4 + $0xa8] sm:$0xff] }
 0x102   :  { %v165_v17 = vmul.f32 %v161_v15, %v161_v15 }
 0x103   :  { %v164_v16 = vmul.f32 %v156_v14, %v156_v14 }
 0x105   :  { %166 = vadd.xlane.f32.xlu0 %v164_v16 }
 0x109   :  { %168 = vadd.xlane.f32.xlu0 %v165_v17 }
 0x192   :  { %v167_v27 = vpop.xlane.xlu0 %166 }
 0x193   :  { %v170_v28 = vmax.f32 %v167_v27, 1e-24 }
 0x195   :  { %873 = vrsqrt.f32 %v170_v28  ;;  %v65_v28 = vld [vmem:[#allocation4 + $0xd0] sm:$0xff] }
 0x196   :  { %v169_v29 = vpop.xlane.xlu0 %168 }
 0x197   :  { %v171_v30 = vmax.f32 %v169_v29, 1e-24  ;;  %v66_v29 = vld [vmem:[#allocation4 + $0xd8] sm:$0xff] }
 0x199   :  { %875 = vrsqrt.f32 %v171_v30  ;;  %v849_v30 = vpack.c.bf16 %v66_v29, %v65_v28 }
 0x19f   :  { %v874_v31 = vpop.eup %873 }
 0x1a0   :  { %v174_v32 = vmul.f32 %v874_v31, %v156_v14  ;;  %v67_v31 = vld [vmem:[#allocation4 + $0xe0] sm:$0xff] }
 0x1a2   :  { %722 = vmatprep.mubr.f32.mxu1 %v174_v32  ;;  %748 = vmatprep.mubr.f32.mxu0 %v174_v32 }
 0x1a3   :  { %v876_v35 = vpop.eup %875 }
 0x1a4   :  { %v175_v36 = vmul.f32 %v876_v35, %v161_v15  ;;  %v837_v15 = vpack.c.bf16 %v60_v11, %v59_v10  ;;  %v70_v35 = vld [vmem:[#allocation4 + $0xf8] sm:$0xff] }
 0x1a6   :  { %723 = vmatmul.mubr.f32.vlgmr.msra.gmra.mrb[0].mxu1 %v175_v36  ;;  %v829_v40 = vpack.c.bf16 %v175_v36, %v174_v32  ;;  %v68_v32 = vld [vmem:[#allocation4 + $0xe8] sm:$0xff] }
 0x1a7   :  { %816 = vmatpush3.bf16.msra.mxu1 %v813_v26  ;;  %v64_v26 = vld [vmem:[#allocation4 + $0xc8] sm:$0xff]  ;;  %v853_v33 = vpack.c.bf16 %v68_v32, %v67_v31 }
 0x1a8   :  { %830 = vmatprep.subr.bf16.mxu0 %v829_v40  ;;  %818 = vmatprep.subr.bf16.mxu1 %v817_v37  ;;  %v845_v27 = vpack.c.bf16 %v64_v26, %v63_v25 }
 0x1a9   :  { %832 = vmatpush3.bf16.xpose.msra.mxu0 %v829_v40  ;;  %v73_v40 = vld [vmem:[#allocation4 + $0x110] sm:$0xff] }
 0x1ab   :  { %820 = vmatpush3.bf16.msra.mxu1 %v817_v37  ;;  %v71_v37 = vld [vmem:[#allocation4 + $0x100] sm:$0xff] }
 0x1ac   :  { %822 = vmatprep.subr.bf16.mxu1 %v821_v41  ;;  %v861_v39 = vpack.c.bf16 %v72_v38, %v71_v37 }
 0x1af   :  { %824 = vmatpush3.bf16.msra.mxu1 %v821_v41  ;;  %v74_v41 = vld [vmem:[#allocation4 + $0x118] sm:$0xff] }
 0x1b0   :  { %749 = vmatmul.mubr.f32.vlgmr.msra.gmra.mrb[2].mxu0 %v175_v36  ;;  %826 = vmatprep.subr.bf16.mxu1 %v825_v44  ;;  %v857_v36 = vpack.c.bf16 %v70_v35, %v69_v34  ;;  %v865_v42 = vpack.c.bf16 %v74_v41, %v73_v40 }
 0x1b3   :  { %828 = vmatpush3.bf16.msra.mxu1 %v825_v44 }
 0x279   :  { %v724_v46 = vpop.f32.mrb[0].mxu1 }
 0x27a   :  { %v242_v47 = vpop.f32.mrb[1].mxu1  ;;  %v252_v50 = vmul.f32 %v724_v46, %v724_v46 }
 0x27b   :  { %v251_v49 = vmul.f32 %v242_v47, %v242_v47 }
 0x27d   :  { %741 = vmatprep.mubr.msk.f32.mxu1 %vm253_vm1, %v251_v49 }
 0x27e   :  { %742 = vmatmul.mubr.msk.f32.vlgmr.msra.gmra.mrb[2].mxu1 %vm253_vm1, %v252_v50  ;;  %v648_v50 = vld [vmem:[#allocation4 + $0x120] ss:$0 sm:$0xff] }
 0x283   :  { %v750_v56 = vpop.f32.mrb[2].mxu0 }
 0x284   :  { %v401_v57 = vpop.f32.mrb[3].mxu0  ;;  %v421_v58 = vmul.f32 %v750_v56, %v750_v56 }
 0x285   :  { %v420_v59 = vmul.f32 %v401_v57, %v401_v57 }
 0x286   :  { %v423_v62 = vsel %vm419_vm3, %v421_v58, -1e+30 }
 0x287   :  { %v422_v60 = vsel %vm418_vm2, %v420_v59, -1e+30  ;;  %v427_v63 = vsel %vm82_vm0, %v423_v62, -inf }
 0x288   :  { %v424_v61 = vsel %vm82_vm0, %v422_v60, -inf }
 0x289   :  { %425 = vmax.xlane.f32.xlu1 %v424_v61 }
 0x28d   :  { %428 = vmax.xlane.f32.xlu1 %v427_v63 }
 0x316   :  { %v426_v0 = vpop.xlane.xlu1 %425 }
 0x317   :  { %v430_v1 = vsub.f32 %v422_v60, %v426_v0 }
 0x319   :  { %v432_v2 = vmul.f32 1.442695, %v430_v1 }
 0x31a   :  { %v429_v3 = vpop.xlane.xlu1 %428 }
 0x31b   :  { %877 = vpow2.f32 %v432_v2  ;;  %v431_v4 = vsub.f32 %v423_v62, %v429_v3 }
 0x31d   :  { %v434_v5 = vmul.f32 1.442695, %v431_v4 }
 0x31f   :  { %879 = vpow2.f32 %v434_v5 }
 0x325   :  { %v878_v6 = vpop.eup %877 }
 0x326   :  { %v436_v7 = vsel %vm82_vm0, %v878_v6, 0.0 }
 0x327   :  { %437 = vadd.xlane.f32.xlu0 %v436_v7 }
 0x329   :  { %v880_v8 = vpop.eup %879 }
 0x32a   :  { %v439_v9 = vsel %vm82_vm0, %v880_v8, 0.0 }
 0x32b   :  { %440 = vadd.xlane.f32.xlu1 %v439_v9 }
 0x351   :  { %v743_v12 = vpop.f32.mrb[2].mxu1 }
 0x352   :  { %v326_v13 = vpop.f32.mrb[3].mxu1 }
 0x353   :  { %v833_v14 = vpack.c.bf16 %v743_v12, %v326_v13 }
 0x355   :  { %834 = vmatprep.subr.bf16.mxu0 %v833_v14 }
 0x356   :  { %836 = vmatpush3.bf16.msra.mxu0 %v833_v14 }
 0x357   :  { %838 = vmatprep.subr.bf16.mxu0 %v837_v15 }
 0x3b4   :  { %v438_v16 = vpop.xlane.xlu0 %437 }
 0x3b5   :  { %881 = vrcp.f32 %v438_v16 }
 0x3b8   :  { %v441_v17 = vpop.xlane.xlu1 %440 }
 0x3b9   :  { %883 = vrcp.f32 %v441_v17 }
 0x3bf   :  { %v882_v18 = vpop.eup %881 }
 0x3c0   :  { %v444_v19 = vmul.f32 %v882_v18, %v878_v6 }
 0x3c2   :  { %755 = vmatprep.mubr.msk.f32.mxu0 %vm82_vm0, %v444_v19 }
 0x3c3   :  { %v884_v22 = vpop.eup %883 }
 0x3c4   :  { %v445_v23 = vmul.f32 %v884_v22, %v880_v8 }
 0x3c6   :  { %756 = vmatmul.mubr.msk.f32.vlgmr.msra.gmra.mrb[4].mxu0 %vm82_vm0, %v445_v23 }
 0x3c7   :  { %840 = vmatpush3.bf16.msra.mxu0 %v837_v15 }
 0x3c8   :  { %842 = vmatprep.subr.bf16.mxu0 %v841_v24 }
 0x3cb   :  { %844 = vmatpush3.bf16.msra.mxu0 %v841_v24 }
 0x3cc   :  { %846 = vmatprep.subr.bf16.mxu0 %v845_v27 }
 0x3cf   :  { %848 = vmatpush3.bf16.msra.mxu0 %v845_v27 }
 0x3d0   :  { %850 = vmatprep.subr.bf16.mxu0 %v849_v30 }
 0x3d3   :  { %852 = vmatpush3.bf16.msra.mxu0 %v849_v30 }
 0x3d4   :  { %854 = vmatprep.subr.bf16.mxu0 %v853_v33 }
 0x3d7   :  { %856 = vmatpush3.bf16.msra.mxu0 %v853_v33 }
 0x3d8   :  { %858 = vmatprep.subr.bf16.mxu0 %v857_v36 }
 0x3db   :  { %860 = vmatpush3.bf16.msra.mxu0 %v857_v36 }
 0x3dc   :  { %862 = vmatprep.subr.bf16.mxu0 %v861_v39 }
 0x3df   :  { %864 = vmatpush3.bf16.msra.mxu0 %v861_v39 }
 0x3e0   :  { %866 = vmatprep.subr.bf16.mxu0 %v865_v42 }
 0x3e3   :  { %868 = vmatpush3.bf16.msra.mxu0 %v865_v42 }
 0x499   :  { %v757_v44 = vpop.f32.mrb[4].mxu0 }
 0x49a   :  { %v528_v45 = vadd.f32 %v757_v44, %v645_v43  ;;  %v522_v46 = vpop.f32.mrb[5].mxu0 }
 0x49b   :  { %v523_v47 = vadd.f32 %v645_v43, %v522_v46 }
 0x49c   :  { %v532_v49 = vmax.f32 %v528_v45, 0.0 }
 0x49d   :  { %v531_v48 = vmax.f32 %v523_v47, 0.0 }
 0x49f   :  { %790 = vmatprep.mubr.f32.mxu0 %v531_v48 }
 0x4a0   :  { %791 = vmatmul.mubr.f32.vlgmr.msra.gmra.mrb[6].mxu0 %v532_v49 }
 0x573   :  { %v792_v51 = vpop.f32.mrb[6].mxu0 }
 0x574   :  { %v609_v52 = vadd.f32 %v792_v51, %v648_v50  ;;  %v603_v53 = vpop.f32.mrb[7].mxu0 }
 0x575   :  { %v604_v54 = vadd.f32 %v648_v50, %v603_v53 }
 0x576   :  { %614 = vmax.xlane.f32.xlu1 %v609_v52 }
 0x577   :  { %612 = vmax.xlane.f32.xlu0 %v604_v54 }
 0x603   :  { %v615_v55 = vpop.xlane.xlu1 %614 }
 0x604   :  { %v617_v56 = vsub.f32 %v609_v52, %v615_v55  ;;  %v613_v57 = vpop.xlane.xlu0 %612 }
 0x605   :  { %v616_v58 = vsub.f32 %v604_v54, %v613_v57 }
 0x606   :  { %v620_v59 = vmul.f32 1.442695, %v617_v56 }
 0x607   :  { %v618_v60 = vmul.f32 1.442695, %v616_v58 }
 0x608   :  { %885 = vpow2.f32 %v620_v59 }
 0x609   :  { %887 = vpow2.f32 %v618_v60 }
 0x612   :  { %v886_v61 = vpop.eup %885 }
 0x613   :  { %v888_v62 = vpop.eup %887  ;;  %624 = vadd.xlane.f32.xlu1 %v886_v61 }
 0x614   :  { %622 = vadd.xlane.f32.xlu0 %v888_v62 }
 0x6a0   :  { %v625_v63 = vpop.xlane.xlu1 %624 }
 0x6a1   :  { %889 = vlog2.f32 %v625_v63  ;;  %v623_v0 = vpop.xlane.xlu0 %622 }
 0x6a2   :  { %891 = vlog2.f32 %v623_v0 }
 0x6ab   :  { %v890_v1 = vpop.eup %889 }
 0x6ac   :  { %v892_v2 = vpop.eup %891  ;;  %v629_v3 = vmul.f32 0.6931472, %v890_v1 }
 0x6ad   :  { %v627_v4 = vmul.f32 0.6931472, %v892_v2 }
 0x6ae   :  { %v631_v5 = vsub.f32 %v617_v56, %v629_v3 }
 0x6af   :  { %v630_v6 = vsub.f32 %v616_v58, %v627_v4 }
 0x6b0   :  { %633 = vst [vmem:[%s1000_s2 + $0x8] sm:$0xff] %v631_v5 }
 0x6b1   :  { %632 = vst [vmem:[%s1000_s2] sm:$0xff] %v630_v6 }
 0x6b2   :  { %638 = vsyncpa [#allocation3], 1 }
 0x6b3   :  { %639 = vsyncpa [#allocation5], 1 }

</bundles_post_ra>
